<compile_context>
chip_gen: v7x
topology: tpu7x:2x2x1
jax: 0.10.0
libtpu: 0.0.40
codegen_flags: <defaults>
</compile_context>

<pallas_src>
import functools

import jax
import jax.numpy as jnp
from jax.experimental import pallas as pl
from jax.experimental.pallas import tpu as pltpu


def _fcn_kernel(num_hidden, n_chunks, *refs):
    """Fused MLP in transposed (features x batch) layout.

    refs (num_hidden > 0):
      x_ref (n_in, Bt), w0 (H, n_in), b0 (H, 1),
      wh (L, H, H), bh (L, H, 1), wl (n_out, H), bl (n_out, 1), out (n_out, Bt)
    The ScaledReLU scale m is already folded into w0/b0/wh/bh.
    The batch tile is split into n_chunks independent column chunks whose layer
    sequences are interleaved (static unroll) to hide MXU result-pop latency.
    """
    if num_hidden > 0:
        x_ref, w0_ref, b0_ref, wh_ref, bh_ref, w_last_ref, b_last_ref, out_ref = refs
    else:
        x_ref, w0_ref, b0_ref, w_last_ref, b_last_ref, out_ref = refs
        wh_ref = bh_ref = None

    n_in, block_b = x_ref.shape
    chunk_b = block_b // n_chunks

    w0 = w0_ref[...]            # (H, n_in)
    b0 = b0_ref[...]            # (H, 1)
    w_last = w_last_ref[...]    # (n_out, H)
    b_last = b_last_ref[...]    # (n_out, 1)

    # --- Layer 0: K = n_in is tiny (2) -> broadcast FMAs on the VPU, not MXU.
    hs = []
    for c in range(n_chunks):
        xc = x_ref[:, c * chunk_b:(c + 1) * chunk_b]          # (n_in, chunk_b)
        h = w0[:, 0:1] * xc[0:1, :]                           # (H, chunk_b)
        for k in range(1, n_in):
            h = h + w0[:, k:k + 1] * xc[k:k + 1, :]
        hs.append(jnp.maximum(h + b0, 0.0))                   # ScaledReLU (m folded)

    # --- Hidden layers: (H, H) @ (H, chunk_b) on the MXU, f32 accumulation.
    #     Chunks are independent -> the unrolled inner loop lets the LLO
    #     scheduler overlap chunk c+1's vmatmul push with chunk c's VPU epilogue.
    for l in range(num_hidden):
        w_l = wh_ref[l]                                        # (H, H)
        b_l = bh_ref[l]                                        # (H, 1)
        hs = [
            jnp.maximum(jnp.dot(w_l, h, preferred_element_type=jnp.float32) + b_l, 0.0)
            for h in hs
        ]

    # --- Final linear (no activation): lane-dense, statically-aligned stores.
    for c in range(n_chunks):
        out = jnp.dot(w_last, hs[c], preferred_element_type=jnp.float32) + b_last
        out_ref[:, c * chunk_b:(c + 1) * chunk_b] = out.astype(out_ref.dtype)


def pack_fcn_params(params, m=1.0):
    """One-time parameter transform (call once, outside the hot path).

    params: list of (W, b) in the PyTorch nn.Linear layout, W: (out, in), b: (out,)
    Folds the ScaledReLU scale m into every Linear that feeds an activation,
    reshapes biases to column vectors for the transposed kernel layout, and
    stacks the hidden-layer weights/biases into single tensors.
    """
    num_linear = len(params)
    assert num_linear >= 2, "FCN always has at least fcs + fce"
    m = jnp.float32(m)

    w0, b0 = params[0]
    wl, bl = params[-1]
    w0 = (m * w0).astype(jnp.float32)                         # feeds a ReLU -> fold m
    b0 = (m * b0).reshape(-1, 1).astype(jnp.float32)
    wl = wl.astype(jnp.float32)                               # final layer: no fold
    bl = bl.reshape(-1, 1).astype(jnp.float32)

    num_hidden = num_linear - 2
    if num_hidden > 0:
        wh = jnp.stack([m * w for w, _ in params[1:-1]]).astype(jnp.float32)
        bh = jnp.stack([(m * b).reshape(-1, 1) for _, b in params[1:-1]]).astype(jnp.float32)
    else:
        wh = None
        bh = None
    return dict(w0=w0, b0=b0, wh=wh, bh=bh, wl=wl, bl=bl)


def fcn_forward(x, packed, *, block_b=1024, n_chunks=2, transposed_io=False):
    """Fused FCN forward pass.

    x: (B, n_in) row-major (PyTorch convention), or (n_in, B) if transposed_io.
    block_b: requested batch tile (sweep 512 / 1024 / 2048); it is rounded to a
      multiple of 128*n_chunks, capped so the grid has >= 2 steps when the batch
      allows it (v7x megacore), and never wider than the rounded-up batch.
    n_chunks: number of independent column sub-chunks interleaved inside the
      kernel to hide the dependent-MXU-chain latency (2-4 is the useful range).
    transposed_io: accept (n_in, B) and return (n_out, B), skipping the
      wrapper transposes when fused into a larger pipeline.
    """
    w0, b0, wh, bh, wl, bl = (packed[k] for k in ("w0", "b0", "wh", "bh", "wl", "bl"))
    if transposed_io:
        n_in, B = x.shape
        xt = x
    else:
        B, n_in = x.shape
        xt = x.T
    assert n_in == w0.shape[1]
    n_out = wl.shape[0]
    num_hidden = 0 if wh is None else wh.shape[0]
    assert n_chunks >= 1

    # --- Tile-size policy ----------------------------------------------------
    chunk_quantum = 128 * n_chunks
    block_b = max(chunk_quantum, (block_b // chunk_quantum) * chunk_quantum)
    if B > chunk_quantum:
        # v7x has 2 TensorCores: keep >= 2 grid steps so "parallel" can shard.
        half_cap = max(chunk_quantum, ((B + 1) // 2) // chunk_quantum * chunk_quantum)
        block_b = min(block_b, half_cap)
    block_b = min(block_b, pl.cdiv(B, chunk_quantum) * chunk_quantum)

    B_pad = pl.cdiv(B, block_b) * block_b
    if B_pad != B:
        xt = jnp.pad(xt, ((0, 0), (0, B_pad - B)))

    def full(shape):
        return pl.BlockSpec(shape, lambda i, _n=len(shape): (0,) * _n)

    in_specs = [pl.BlockSpec((n_in, block_b), lambda i: (0, i)),
                full(w0.shape), full(b0.shape)]
    inputs = [xt, w0, b0]
    if num_hidden > 0:
        in_specs += [full(wh.shape), full(bh.shape)]
        inputs += [wh, bh]
    in_specs += [full(wl.shape), full(bl.shape)]
    inputs += [wl, bl]

    out_t = pl.pallas_call(
        functools.partial(_fcn_kernel, num_hidden, n_chunks),
        out_shape=jax.ShapeDtypeStruct((n_out, B_pad), x.dtype),
        grid=(B_pad // block_b,),
        in_specs=in_specs,
        out_specs=pl.BlockSpec((n_out, block_b), lambda i: (0, i)),
        compiler_params=pltpu.CompilerParams(
            dimension_semantics=("parallel",)),
    )(*inputs)

    out_t = out_t[:, :B]
    return out_t if transposed_io else out_t.T


def init_fcn_params(key, n_input, n_output, n_hidden, n_layers):
    """Xavier-uniform weights (gain=1.0), zero biases, PyTorch (out, in) layout."""
    dims = [n_input] + [n_hidden] * n_layers + [n_output]
    params = []
    for i in range(len(dims) - 1):
        key, sub = jax.random.split(key)
        fan_in, fan_out = dims[i], dims[i + 1]
        bound = (6.0 / (fan_in + fan_out)) ** 0.5
        w = jax.random.uniform(sub, (fan_out, fan_in), jnp.float32, -bound, bound)
        b = jnp.zeros((fan_out,), jnp.float32)
        params.append((w, b))
    return params


def fcn_reference(x, params, m=1.0):
    """Pure-JAX reference matching the PyTorch FCN forward exactly."""
    h = x
    for li, (w, b) in enumerate(params):
        h = h @ w.T + b
        if li < len(params) - 1:
            h = jnp.maximum(m * h, 0.0)       # ScaledReLU
    return h


if __name__ == "__main__":
    # Shapes consistent with the PINN FCN: (x, t) -> phase-field value.
    N_INPUT, N_OUTPUT, N_HIDDEN, N_LAYERS = 2, 1, 32, 3
    M_SCALE = 1.5          # non-trivial scale to exercise the folded ScaledReLU
    BATCH = 512            # block_b auto-caps to 256 -> 2-step parallel grid (v7x)

    key = jax.random.PRNGKey(0)
    key, xkey = jax.random.split(key)
    x = jax.random.normal(xkey, (BATCH, N_INPUT), dtype=jnp.float32)

    params = init_fcn_params(key, N_INPUT, N_OUTPUT, N_HIDDEN, N_LAYERS)
    packed = pack_fcn_params(params, m=M_SCALE)   # one-time m-fold / stack / reshape

    ref = fcn_reference(x, params, m=M_SCALE)

    # Standard (B, n_in) -> (B, n_out) path.
    out = fcn_forward(x, packed, block_b=1024, n_chunks=2)
    out = jax.block_until_ready(out)
    assert out.shape == (BATCH, N_OUTPUT)
    assert jnp.allclose(out, ref, atol=5e-5, rtol=5e-5), "mismatch vs reference"

    # Transposed-I/O path (no wrapper transposes) must match as well.
    out_t = fcn_forward(x.T, packed, block_b=1024, n_chunks=2, transposed_io=True)
    out_t = jax.block_until_ready(out_t)
    assert out_t.shape == (N_OUTPUT, BATCH)
    assert jnp.allclose(out_t.T, ref, atol=5e-5, rtol=5e-5), "mismatch (transposed io)"

    print("KERNEL_OK")
</pallas_src>

<mosaic_0001>
module attributes {stable_mosaic.version = 11 : i64} {
  func.func @_fcn_kernel(%arg0: i32, %arg1: memref<2x256xf32, #tpu.memory_space<vmem>>, %arg2: memref<32x2xf32, #tpu.memory_space<vmem>>, %arg3: memref<32x1xf32, #tpu.memory_space<vmem>>, %arg4: memref<2x32x32xf32, #tpu.memory_space<vmem>>, %arg5: memref<2x32x1xf32, #tpu.memory_space<vmem>>, %arg6: memref<1x32xf32, #tpu.memory_space<vmem>>, %arg7: memref<1x1xf32, #tpu.memory_space<vmem>>, %arg8: memref<1x256xf32, #tpu.memory_space<vmem>>) attributes {dimension_semantics = [#tpu.dimension_semantics<parallel>], iteration_bounds = array<i64: 2>, scalar_prefetch = 0 : i64, scratch_operands = 0 : i64, tpu.core_type = #tpu.core_type<tc>, window_params = [{transform_indices = @transform_0, window_bounds = array<i64: 2, 256>}, {pipeline_mode = #tpu.pipeline_mode<synchronous>, transform_indices = @transform_1, window_bounds = array<i64: 32, 2>}, {pipeline_mode = #tpu.pipeline_mode<synchronous>, transform_indices = @transform_2, window_bounds = array<i64: 32, 1>}, {pipeline_mode = #tpu.pipeline_mode<synchronous>, transform_indices = @transform_3, window_bounds = array<i64: 2, 32, 32>}, {pipeline_mode = #tpu.pipeline_mode<synchronous>, transform_indices = @transform_4, window_bounds = array<i64: 2, 32, 1>}, {pipeline_mode = #tpu.pipeline_mode<synchronous>, transform_indices = @transform_5, window_bounds = array<i64: 1, 32>}, {pipeline_mode = #tpu.pipeline_mode<synchronous>, transform_indices = @transform_6, window_bounds = array<i64: 1, 1>}, {transform_indices = @transform_7, window_bounds = array<i64: 1, 256>}]} {
    %c0 = arith.constant 0 : index
    %c0_0 = arith.constant 0 : index
    %0 = vector.load %arg2[%c0, %c0_0] : memref<32x2xf32, #tpu.memory_space<vmem>>, vector<32x2xf32>
    %c0_1 = arith.constant 0 : index
    %c0_2 = arith.constant 0 : index
    %1 = vector.load %arg3[%c0_1, %c0_2] : memref<32x1xf32, #tpu.memory_space<vmem>>, vector<32x1xf32>
    %c0_3 = arith.constant 0 : index
    %c0_4 = arith.constant 0 : index
    %2 = vector.load %arg6[%c0_3, %c0_4] : memref<1x32xf32, #tpu.memory_space<vmem>>, vector<1x32xf32>
    %c0_5 = arith.constant 0 : index
    %c0_6 = arith.constant 0 : index
    %3 = vector.load %arg7[%c0_5, %c0_6] : memref<1x1xf32, #tpu.memory_space<vmem>>, vector<1x1xf32>
    %c0_7 = arith.constant 0 : index
    %c0_8 = arith.constant 0 : index
    %4 = vector.load %arg1[%c0_7, %c0_8] : memref<2x256xf32, #tpu.memory_space<vmem>>, vector<2x128xf32>
    %5 = vector.extract_strided_slice %0 {offsets = [0, 0], sizes = [32, 1], strides = [1, 1]} : vector<32x2xf32> to vector<32x1xf32>
    %6 = vector.extract_strided_slice %4 {offsets = [0, 0], sizes = [1, 128], strides = [1, 1]} : vector<2x128xf32> to vector<1x128xf32>
    %7 = vector.broadcast %5 : vector<32x1xf32> to vector<32x128xf32>
    %8 = vector.broadcast %6 : vector<1x128xf32> to vector<32x128xf32>
    %9 = arith.mulf %7, %8 : vector<32x128xf32>
    %10 = vector.extract_strided_slice %0 {offsets = [0, 1], sizes = [32, 1], strides = [1, 1]} : vector<32x2xf32> to vector<32x1xf32>
    %11 = vector.extract_strided_slice %4 {offsets = [1, 0], sizes = [1, 128], strides = [1, 1]} : vector<2x128xf32> to vector<1x128xf32>
    %12 = vector.broadcast %10 : vector<32x1xf32> to vector<32x128xf32>
    %13 = vector.broadcast %11 : vector<1x128xf32> to vector<32x128xf32>
    %14 = arith.mulf %12, %13 : vector<32x128xf32>
    %15 = arith.addf %9, %14 : vector<32x128xf32>
    %16 = vector.broadcast %1 : vector<32x1xf32> to vector<32x128xf32>
    %17 = arith.addf %15, %16 : vector<32x128xf32>
    %cst = arith.constant 0.000000e+00 : f32
    %18 = vector.broadcast %cst : f32 to vector<32x128xf32>
    %19 = arith.maximumf %17, %18 : vector<32x128xf32>
    %c0_9 = arith.constant 0 : index
    %c128 = arith.constant 128 : index
    %20 = vector.load %arg1[%c0_9, %c128] : memref<2x256xf32, #tpu.memory_space<vmem>>, vector<2x128xf32>
    %21 = vector.extract_strided_slice %0 {offsets = [0, 0], sizes = [32, 1], strides = [1, 1]} : vector<32x2xf32> to vector<32x1xf32>
    %22 = vector.extract_strided_slice %20 {offsets = [0, 0], sizes = [1, 128], strides = [1, 1]} : vector<2x128xf32> to vector<1x128xf32>
    %23 = vector.broadcast %21 : vector<32x1xf32> to vector<32x128xf32>
    %24 = vector.broadcast %22 : vector<1x128xf32> to vector<32x128xf32>
    %25 = arith.mulf %23, %24 : vector<32x128xf32>
    %26 = vector.extract_strided_slice %0 {offsets = [0, 1], sizes = [32, 1], strides = [1, 1]} : vector<32x2xf32> to vector<32x1xf32>
    %27 = vector.extract_strided_slice %20 {offsets = [1, 0], sizes = [1, 128], strides = [1, 1]} : vector<2x128xf32> to vector<1x128xf32>
    %28 = vector.broadcast %26 : vector<32x1xf32> to vector<32x128xf32>
    %29 = vector.broadcast %27 : vector<1x128xf32> to vector<32x128xf32>
    %30 = arith.mulf %28, %29 : vector<32x128xf32>
    %31 = arith.addf %25, %30 : vector<32x128xf32>
    %32 = vector.broadcast %1 : vector<32x1xf32> to vector<32x128xf32>
    %33 = arith.addf %31, %32 : vector<32x128xf32>
    %cst_10 = arith.constant 0.000000e+00 : f32
    %34 = vector.broadcast %cst_10 : f32 to vector<32x128xf32>
    %35 = arith.maximumf %33, %34 : vector<32x128xf32>
    %c0_11 = arith.constant 0 : index
    %c0_12 = arith.constant 0 : index
    %c0_13 = arith.constant 0 : index
    %36 = vector.load %arg4[%c0_11, %c0_12, %c0_13] : memref<2x32x32xf32, #tpu.memory_space<vmem>>, vector<1x32x32xf32>
    %37 = vector.shape_cast %36 : vector<1x32x32xf32> to vector<32x32xf32>
    %c0_14 = arith.constant 0 : index
    %c0_15 = arith.constant 0 : index
    %c0_16 = arith.constant 0 : index
    %38 = vector.load %arg5[%c0_14, %c0_15, %c0_16] : memref<2x32x1xf32, #tpu.memory_space<vmem>>, vector<1x32x1xf32>
    %39 = vector.shape_cast %38 : vector<1x32x1xf32> to vector<32x1xf32>
    %cst_17 = arith.constant dense<0.000000e+00> : vector<32x128xf32>
    %40 = tpu.matmul %37, %19, %cst_17 {dimension_numbers = #tpu.dot_dimension_numbers<[1], [0], [0], [1], [0, 0, 1, 1], [], []>} : vector<32x32xf32>, vector<32x128xf32>, vector<32x128xf32> -> vector<32x128xf32>
    %41 = vector.broadcast %39 : vector<32x1xf32> to vector<32x128xf32>
    %42 = arith.addf %40, %41 : vector<32x128xf32>
    %cst_18 = arith.constant 0.000000e+00 : f32
    %43 = vector.broadcast %cst_18 : f32 to vector<32x128xf32>
    %44 = arith.maximumf %42, %43 : vector<32x128xf32>
    %cst_19 = arith.constant dense<0.000000e+00> : vector<32x128xf32>
    %45 = tpu.matmul %37, %35, %cst_19 {dimension_numbers = #tpu.dot_dimension_numbers<[1], [0], [0], [1], [0, 0, 1, 1], [], []>} : vector<32x32xf32>, vector<32x128xf32>, vector<32x128xf32> -> vector<32x128xf32>
    %46 = vector.broadcast %39 : vector<32x1xf32> to vector<32x128xf32>
    %47 = arith.addf %45, %46 : vector<32x128xf32>
    %cst_20 = arith.constant 0.000000e+00 : f32
    %48 = vector.broadcast %cst_20 : f32 to vector<32x128xf32>
    %49 = arith.maximumf %47, %48 : vector<32x128xf32>
    %c1 = arith.constant 1 : index
    %c0_21 = arith.constant 0 : index
    %c0_22 = arith.constant 0 : index
    %50 = vector.load %arg4[%c1, %c0_21, %c0_22] : memref<2x32x32xf32, #tpu.memory_space<vmem>>, vector<1x32x32xf32>
    %51 = vector.shape_cast %50 : vector<1x32x32xf32> to vector<32x32xf32>
    %c1_23 = arith.constant 1 : index
    %c0_24 = arith.constant 0 : index
    %c0_25 = arith.constant 0 : index
    %52 = vector.load %arg5[%c1_23, %c0_24, %c0_25] : memref<2x32x1xf32, #tpu.memory_space<vmem>>, vector<1x32x1xf32>
    %53 = vector.shape_cast %52 : vector<1x32x1xf32> to vector<32x1xf32>
    %cst_26 = arith.constant dense<0.000000e+00> : vector<32x128xf32>
    %54 = tpu.matmul %51, %44, %cst_26 {dimension_numbers = #tpu.dot_dimension_numbers<[1], [0], [0], [1], [0, 0, 1, 1], [], []>} : vector<32x32xf32>, vector<32x128xf32>, vector<32x128xf32> -> vector<32x128xf32>
    %55 = vector.broadcast %53 : vector<32x1xf32> to vector<32x128xf32>
    %56 = arith.addf %54, %55 : vector<32x128xf32>
    %cst_27 = arith.constant 0.000000e+00 : f32
    %57 = vector.broadcast %cst_27 : f32 to vector<32x128xf32>
    %58 = arith.maximumf %56, %57 : vector<32x128xf32>
    %cst_28 = arith.constant dense<0.000000e+00> : vector<32x128xf32>
    %59 = tpu.matmul %51, %49, %cst_28 {dimension_numbers = #tpu.dot_dimension_numbers<[1], [0], [0], [1], [0, 0, 1, 1], [], []>} : vector<32x32xf32>, vector<32x128xf32>, vector<32x128xf32> -> vector<32x128xf32>
    %60 = vector.broadcast %53 : vector<32x1xf32> to vector<32x128xf32>
    %61 = arith.addf %59, %60 : vector<32x128xf32>
    %cst_29 = arith.constant 0.000000e+00 : f32
    %62 = vector.broadcast %cst_29 : f32 to vector<32x128xf32>
    %63 = arith.maximumf %61, %62 : vector<32x128xf32>
    %cst_30 = arith.constant dense<0.000000e+00> : vector<1x128xf32>
    %64 = tpu.matmul %2, %58, %cst_30 {dimension_numbers = #tpu.dot_dimension_numbers<[1], [0], [0], [1], [0, 0, 1, 1], [], []>} : vector<1x32xf32>, vector<32x128xf32>, vector<1x128xf32> -> vector<1x128xf32>
    %65 = vector.broadcast %3 : vector<1x1xf32> to vector<1x128xf32>
    %66 = arith.addf %64, %65 : vector<1x128xf32>
    %c0_31 = arith.constant 0 : index
    %c0_32 = arith.constant 0 : index
    %67 = vector.load %arg8[%c0_31, %c0_32] : memref<1x256xf32, #tpu.memory_space<vmem>>, vector<1x128xf32>
    tpu.vector_store %arg8[%c0_31, %c0_32], %66 {strides = array<i32>} : memref<1x256xf32, #tpu.memory_space<vmem>>, vector<1x128xf32>,
    %cst_33 = arith.constant dense<0.000000e+00> : vector<1x128xf32>
    %68 = tpu.matmul %2, %63, %cst_33 {dimension_numbers = #tpu.dot_dimension_numbers<[1], [0], [0], [1], [0, 0, 1, 1], [], []>} : vector<1x32xf32>, vector<32x128xf32>, vector<1x128xf32> -> vector<1x128xf32>
    %69 = vector.broadcast %3 : vector<1x1xf32> to vector<1x128xf32>
    %70 = arith.addf %68, %69 : vector<1x128xf32>
    %c0_34 = arith.constant 0 : index
    %c128_35 = arith.constant 128 : index
    %71 = vector.load %arg8[%c0_34, %c128_35] : memref<1x256xf32, #tpu.memory_space<vmem>>, vector<1x128xf32>
    tpu.vector_store %arg8[%c0_34, %c128_35], %70 {strides = array<i32>} : memref<1x256xf32, #tpu.memory_space<vmem>>, vector<1x128xf32>,
    return
  }
  func.func @transform_0(%arg0: i32) -> (i32, i32) {
    %c0_i32 = arith.constant 0 : i32
    %c0_i32_0 = arith.constant 0 : i32
    return %c0_i32, %arg0 : i32, i32
  }
  func.func @transform_1(%arg0: i32) -> (i32, i32) {
    %c0_i32 = arith.constant 0 : i32
    %c0_i32_0 = arith.constant 0 : i32
    %c0_i32_1 = arith.constant 0 : i32
    return %c0_i32, %c0_i32_0 : i32, i32
  }
  func.func @transform_2(%arg0: i32) -> (i32, i32) {
    %c0_i32 = arith.constant 0 : i32
    %c0_i32_0 = arith.constant 0 : i32
    %c0_i32_1 = arith.constant 0 : i32
    return %c0_i32, %c0_i32_0 : i32, i32
  }
  func.func @transform_3(%arg0: i32) -> (i32, i32, i32) {
    %c0_i32 = arith.constant 0 : i32
    %c0_i32_0 = arith.constant 0 : i32
    %c0_i32_1 = arith.constant 0 : i32
    %c0_i32_2 = arith.constant 0 : i32
    return %c0_i32, %c0_i32_0, %c0_i32_1 : i32, i32, i32
  }
  func.func @transform_4(%arg0: i32) -> (i32, i32, i32) {
    %c0_i32 = arith.constant 0 : i32
    %c0_i32_0 = arith.constant 0 : i32
    %c0_i32_1 = arith.constant 0 : i32
    %c0_i32_2 = arith.constant 0 : i32
    return %c0_i32, %c0_i32_0, %c0_i32_1 : i32, i32, i32
  }
  func.func @transform_5(%arg0: i32) -> (i32, i32) {
    %c0_i32 = arith.constant 0 : i32
    %c0_i32_0 = arith.constant 0 : i32
    %c0_i32_1 = arith.constant 0 : i32
    return %c0_i32, %c0_i32_0 : i32, i32
  }
  func.func @transform_6(%arg0: i32) -> (i32, i32) {
    %c0_i32 = arith.constant 0 : i32
    %c0_i32_0 = arith.constant 0 : i32
    %c0_i32_1 = arith.constant 0 : i32
    return %c0_i32, %c0_i32_0 : i32, i32
  }
  func.func @transform_7(%arg0: i32) -> (i32, i32) {
    %c0_i32 = arith.constant 0 : i32
    %c0_i32_0 = arith.constant 0 : i32
    return %c0_i32, %arg0 : i32, i32
  }
}

</mosaic_0001>

<bundles_post_ra>
// kernel: tpu_custom_call.1
= control target key start
LH: loop header
LB: loop body
LE: loop exit
PB: predicated region body
PF: predicated region fallthrough
CT: control target
= control target key end

     0   :  { %s1642_s0 = inlined_call_operand.vmem [shape: f32[2,512], index: 0, kind: input, shape index: {}]   ;;  %s1643_s1 = inlined_call_operand.vmem [shape: f32[32,2], index: 1, kind: input, shape index: {}]   ;;  %s1644_s2 = inlined_call_operand.vmem [shape: f32[32,1], index: 2, kind: input, shape index: {}]   ;;  %s1645_s3 = inlined_call_operand.vmem [shape: f32[2,32,32], index: 3, kind: input, shape index: {}]   ;;  %s1646_s4 = inlined_call_operand.vmem [shape: f32[2,32,1], index: 4, kind: input, shape index: {}]   ;;  %s1647_s5 = inlined_call_operand.vmem [shape: f32[1,32], index: 5, kind: input, shape index: {}]   ;;  %s1648_s6 = inlined_call_operand.<no memory space> [shape: f32[1,1], index: 6, kind: input, shape index: {}]   ;;  %s1649_s7 = inlined_call_operand.hbm [shape: f32[1,512], index: 7, kind: output, shape index: {}]  }
   0x1   :  { %v12_v0 = vstv %s1648_s6 }
   0x2   :  { %13 = vst [vmem:[#allocation2] sm:$0x1] %v12_v0 }
   0x3   :  { %14 = vsyncpa [#allocation4], 0 }
   0x4   :  { %16 = vsyncpa [#allocation4 + $0x1], 0  ;;  %s1443_s26 = smov 0   ;;  %s1445_s27 = smov 0  }
   0x5   :  { %s1447_s28 = smov 0   ;;  %s1449_s29 = smov 0  }
   0x6 LB: > { %s1464_s6 = sadd.s32 4294967295, %s1392_s29   ;;  %s1077_s30 = sadd.s32 4294967294, %s1392_s29   ;;  %s1392_s29 = sphi %s1449_s29, %s1655_s29   ;;  %s1388_s28 = sphi %s1447_s28, %s1654_s28   ;;  %s1384_s27 = sphi %s1445_s27, %s1653_s27   ;;  %s1380_s26 = sphi %s1443_s26, %s1652_s26  }
   0x7   : > { %s1468_s8 = sadd.s32 1, %s1392_s29   ;;  %s181_s9 = sadd.s32 1, %s1388_s28 }
   0x8   : > { %s178_s10 = ssub.s32 %s1392_s29, %s1468_s8  ;;  %p191_p0 = scmp.ne.s32.totalorder %s1388_s28, %s1384_s27 }
   0x9   : > { %p179_p1 = scmp.eq.s32.totalorder %s178_s10, 0  ;;  %p192_p2 = scmp.eq.s32.totalorder %s1464_s6, 1 }
   0xa   : > { %p197_p3 = scmp.ne.s32.totalorder %s1384_s27, %s1380_s26  ;;  %p198_p4 = scmp.eq.s32.totalorder %s1077_s30, 1 }
   0xb   : > { %s1479_s11 = scalar_select %p179_p1, %s1388_s28, %s181_s9  }
   0xc   : > { %p1481_p5 = por %p192_p2, %p191_p0  ;;  %p1485_p6 = por %p198_p4, %p197_p3 }
   0xd   : > { %p1080_p7 = scmp.ge.s32.totalorder %s1392_s29, 1  ;;  %p243_p8 = scmp.lt.s32.totalorder %s1392_s29, 3 }
   0xf   : > { %p244_p9 = pnand %p1080_p7, %p243_p8 }
  0x10   : > { %v284_v1 = vld [vmem:[%s1643_s1 + $0x10] sm:$0xff] (!%p244_p9)  ;;  %v282_v2 = vld [vmem:[%s1643_s1] sm:$0xff] (!%p244_p9)  ;;  %v1394_v3 = vmov (!%p244_p9), 1   ;;  %v283_v4 = vld [vmem:[%s1643_s1 + $0x8] sm:$0xff] (!%p244_p9)  ;;  %v1395_v5 = vmov (!%p244_p9), 0   ;;  %vm434_vm0 = vcmask (!%p244_p9), 261120   ;;  %v313_v21 = vlaneseq (!%p244_p9) }
  0x11   : > { %247 = sbr.rel (%p244_p9) target bundleno = 864 (0x360), region = 48  ;;  %1326 = vset.pattern.permute.xlu0 (!%p244_p9), %v1394_v3  ;;  %1324 = vset.pattern.permute.xlu1 (!%p244_p9), %v1394_v3  ;;  %v285_v6 = vld [vmem:[%s1643_s1 + $0x18] sm:$0xff] (!%p244_p9)  ;;  %v287_v7 = vld [vmem:[%s1644_s2 + $0x8] sm:$0xff] (!%p244_p9)  ;;  %v286_v8 = vld [vmem:[%s1644_s2] sm:$0xff] (!%p244_p9)  ;;  %s1082_s18 = sshll.u32 (!%p244_p9), %s1464_s6, 1  ;;  %vm1397_vm1 = vmmov (!%p244_p9), 0  }
  0x12   : > { %330 = vperm.xlu0 (!%p244_p9), %1326, %v284_v1   ;;  %322 = vperm.xlu1 (!%p244_p9), %1324, %v282_v2   ;;  %v410_v9 = vld [vmem:[%s1646_s4] sm:$0xff] (!%p244_p9)  ;;  %v288_v10 = vld [vmem:[%s1644_s2 + $0x10] sm:$0xff] (!%p244_p9)  ;;  %v289_v12 = vld [vmem:[%s1644_s2 + $0x18] sm:$0xff] (!%p244_p9)  ;;  %p276_p10 = scmp.lt.s32.totalorder (!%p244_p9), %s1082_s18, 3  ;;  %v314_v24 = vshrl.u32 (!%p244_p9), %v313_v21, 7  ;;  %s272_s24 = sand.u32 (!%p244_p9), 1, %s1384_s27  }
  0x13   : > { %v412_v11 = vld [vmem:[%s1646_s4 + $0x10] sm:$0xff] (!%p244_p9)  ;;  %v1096_v13 = vld [vmem:[%s1646_s4 + $0x20] sm:$0xff] (!%p244_p9)  ;;  %v411_v14 = vld [vmem:[%s1646_s4 + $0x8] sm:$0xff] (!%p244_p9)  ;;  %s1081_s25 = sshll.u32 (!%p244_p9), %s272_s24, 1  ;;  %s1115_s30 = sshll.u32 (!%p244_p9), %s1464_s6, 5  ;;  %vm929_vm2 = vcmp.lt.s32.totalorder (!%p244_p9), %v313_v21, 128 }
  0x14   : > { %v1098_v15 = vld [vmem:[%s1646_s4 + $0x30] sm:$0xff] (!%p244_p9)  ;;  %v413_v16 = vld [vmem:[%s1646_s4 + $0x18] sm:$0xff] (!%p244_p9)  ;;  %v291_v17 = vld [vmem:[#allocation2] sm:$0x1] (!%p244_p9)  ;;  %v1549_v27 = vsub.s32 (!%p244_p9), 0, %v314_v24  ;;  %v339_v28 = vsub.s32 (!%p244_p9), 1, %v314_v24  ;;  %s1600_s16 = scalar_lea.hbm (!%p244_p9), %s1649_s7, %s1115_s30 }
  0x15   : > { %v406_v18 = vld [vmem:[%s1645_s3] sm:$0xff] (!%p244_p9)  ;;  %v1097_v19 = vld [vmem:[%s1646_s4 + $0x28] sm:$0xff] (!%p244_p9)  ;;  %v1099_v20 = vld [vmem:[%s1646_s4 + $0x38] sm:$0xff] (!%p244_p9)  ;;  %s274_s9 = scalar_lea.vmem (!%p244_p9), [#allocation3], %s1081_s25  ;;  %s1004_s6 = scalar_lea.sflag (!%p244_p9), [#allocation4], %s272_s24 }
  0x16   : > { %1327 = vset.pattern.permute.xlu0 (!%p244_p9), %v1395_v5  ;;  %326 = vperm.xlu1 (!%p244_p9), %1324, %v283_v4   ;;  %v407_v24 = vld [vmem:[%s1645_s3 + $0x8] sm:$0xff] (!%p244_p9)  ;;  %s1018_s10 = sshll.u32 (!%p244_p9), %s274_s9, 4  ;;  %s1602_s10 = int_to_ptr.vmem [resolvable:$true] %s1018_s10 }
  0x17   : > { %295 = vperm.xlu0 (!%p244_p9), %1327, %v282_v2   ;;  %1166 = vmatprep.mubr.msk.f32.mxu0 (!%p244_p9), %vm434_vm0, %v406_v18  ;;  %s1330_s17 = scalar_lea.vmem (!%p244_p9), %s1602_s10, 32 }
  0x18   : > { %1180 = vmatprep.mubr.msk.f32.mxu1 %vm434_vm0, %v406_v18  ;;  %s1657_s18 = smov (!%p276_p10, %s1082_s18), 3  ;;  %p1331_p11 = scmp.ne.s32.totalorder %s1602_s10, %s1330_s17 }
  0x19   : > { %s1083_s19 = sshll.u32 %s1657_s18, 1  ;;  %s1399_s18 = smov [#allocation3]  }
  0x1a   : > { %1325 = vset.pattern.permute.xlu1 %v1395_v5  ;;  %s279_s22 = scalar_lea.vmem %s1642_s0, %s1083_s19  ;;  %p1332_p12 = pnand %p1331_p11, %p1481_p5 }
  0x1b   : > { %300 = vperm.xlu0 %1327, %v283_v4   ;;  %310 = vperm.xlu1 %1325, %v285_v6   ;;  %v292_v29 = vld [vmem:[%s279_s22] sm:$0x3]  ;;  %v377_v30 = vld [vmem:[%s279_s22 + $0x2] sm:$0x3]  ;;  %s1334_s19 = sshll.u32 %s1399_s18, 4  ;;  %s1335_s19 = int_to_ptr.vmem [resolvable:$false] %s1334_s19 }
  0x1c   : > { %v316_v33 = vrot.slane %v292_v29, %v1549_v27  ;;  %v381_v34 = vrot.slane %v377_v30, %v1549_v27  ;;  %v340_v35 = vrot.slane %v292_v29, %v339_v28  ;;  %v389_v36 = vrot.slane %v377_v30, %v339_v28  ;;  %v1092_v28 = vld [vmem:[%s1645_s3 + $0x20] sm:$0xff]  ;;  %p1333_p13 = pneg %p1332_p12  ;;  %s1336_s20 = scalar_lea.vmem %s1335_s19, 64 }
  0x1d   : > { %p1337_p0 = scmp.lt.s32.totalorder %s1602_s10, %s1335_s19  ;;  %p1338_p1 = scmp.lt.s32.totalorder %s1336_s20, %s1330_s17 }
  0x1f   : > { %305 = vperm.xlu0 %1327, %v284_v1   ;;  %1328 = vset.pattern.permute.xlu1 %v1394_v3  ;;  %p1339_p2 = por %p1338_p1, %p1337_p0 }
  0x20   : > { %334 = vperm.xlu1 %1328, %v285_v6  }
  0x21   : > { %p1340_p3 = pnand %p1339_p2, %p1333_p13 }
  0x23   : > { %356 = vperm.xlu0 %1327, %v287_v7  }
  0x24   : > { %1329 = vset.pattern.permute.xlu1 %v1395_v5 }
  0x25   : > { %351 = vperm.xlu1 %1329, %v286_v8  }
  0x27   : > { %416 = vperm.xlu0 %1327, %v410_v9  }
  0x29   : > { %361 = vperm.xlu1 %1329, %v288_v10  }
  0x2b   : > { %426 = vperm.xlu0 %1327, %v412_v11  }
  0x2d   : > { %366 = vperm.xlu1 %1329, %v289_v12  }
  0x2f   : > { %637 = vperm.xlu0 %1327, %v1096_v13  }
  0x31   : > { %421 = vperm.xlu1 %1329, %v411_v14  }
  0x33   : > { %647 = vperm.xlu0 %1327, %v1098_v15  }
  0x35   : > { %431 = vperm.xlu1 %1329, %v413_v16  }
  0x37   : > { %847 = vperm.xlu0 %1327, %v291_v17  }
  0x39   : > { %642 = vperm.xlu1 %1329, %v1097_v19  }
  0x3d   : > { %652 = vperm.xlu1 %1329, %v1099_v20  }
  0x91   : > { %v323_v22 = vpop.permute.xlu1 %322  ;;  %v331_v23 = vpop.permute.xlu0 %330 }
  0x92   : > { %v341_v45 = vmul.f32 %v340_v35, %v323_v22  ;;  %v390_v46 = vmul.f32 %v389_v36, %v323_v22  ;;  %v343_v59 = vmul.f32 %v340_v35, %v331_v23  ;;  %v392_v60 = vmul.f32 %v389_v36, %v331_v23 }
  0x95   : > { %v327_v25 = vpop.permute.xlu1 %326 }
  0x96   : > { %v296_v26 = vpop.permute.xlu0 %295  ;;  %v342_v40 = vmul.f32 %v340_v35, %v327_v25  ;;  %v391_v41 = vmul.f32 %v389_v36, %v327_v25  ;;  %v408_v25 = vld [vmem:[%s1645_s3 + $0x10] sm:$0xff] }
  0x97   : > { %v317_v42 = vmul.f32 %v316_v33, %v296_v26  ;;  %v382_v43 = vmul.f32 %v381_v34, %v296_v26  ;;  %v409_v26 = vld [vmem:[%s1645_s3 + $0x18] sm:$0xff] }
  0x99   : > { %v345_v52 = vadd.f32 %v341_v45, %v317_v42  ;;  %v394_v53 = vadd.f32 %v390_v46, %v382_v43 }
  0x9a   : > { %v301_v31 = vpop.permute.xlu0 %300  ;;  %v311_v32 = vpop.permute.xlu1 %310 }
  0x9b   : > { %v318_v37 = vmul.f32 %v316_v33, %v301_v31  ;;  %v383_v38 = vmul.f32 %v381_v34, %v301_v31  ;;  %v320_v3 = vmul.f32 %v316_v33, %v311_v32  ;;  %v385_v4 = vmul.f32 %v381_v34, %v311_v32 }
  0x9d   : > { %v346_v47 = vadd.f32 %v342_v40, %v318_v37  ;;  %v395_v48 = vadd.f32 %v391_v41, %v383_v38 }
  0x9e   : > { %v306_v39 = vpop.permute.xlu0 %305 }
  0x9f   : > { %v335_v44 = vpop.permute.xlu1 %334  ;;  %v319_v55 = vmul.f32 %v316_v33, %v306_v39  ;;  %v384_v56 = vmul.f32 %v381_v34, %v306_v39 }
  0xa0   : > { %v344_v61 = vmul.f32 %v340_v35, %v335_v44  ;;  %v393_v62 = vmul.f32 %v389_v36, %v335_v44 }
  0xa1   : > { %v347_v6 = vadd.f32 %v343_v59, %v319_v55  ;;  %v396_v7 = vadd.f32 %v392_v60, %v384_v56 }
  0xa2   : > { %v357_v49 = vpop.permute.xlu0 %356  ;;  %v348_v10 = vadd.f32 %v344_v61, %v320_v3  ;;  %v397_v13 = vadd.f32 %v393_v62, %v385_v4  ;;  %v1093_v61 = vld [vmem:[%s1645_s3 + $0x28] sm:$0xff]  ;;  %v1094_v62 = vld [vmem:[%s1645_s3 + $0x30] sm:$0xff] }
  0xa3   : > { %v370_v50 = vadd.f32 %v357_v49, %v346_v47  ;;  %v399_v51 = vadd.f32 %v395_v48, %v357_v49 }
  0xa4   : > { %v352_v54 = vpop.permute.xlu1 %351 }
  0xa5   : > { %v369_v57 = vadd.f32 %v352_v54, %v345_v52  ;;  %v398_v58 = vadd.f32 %v394_v53, %v352_v54  ;;  %v374_v63 = vmax.f32 %v370_v50, 0.0  ;;  %v403_v0 = vmax.f32 %v399_v51, 0.0 }
  0xa6   : > { %v417_v29 = vpop.permute.xlu0 %416 }
  0xa7   : > { %v373_v1 = vmax.f32 %v369_v57, 0.0  ;;  %v402_v2 = vmax.f32 %v398_v58, 0.0 }
  0xa8   : > { %v362_v5 = vpop.permute.xlu1 %361 }
  0xa9   : > { %v1236_v8 = vpack.c.bf16 %v374_v63, %v373_v1  ;;  %v1244_v9 = vpack.c.bf16 %v403_v0, %v402_v2  ;;  %v371_v11 = vadd.f32 %v362_v5, %v347_v6  ;;  %v400_v12 = vadd.f32 %v396_v7, %v362_v5  ;;  %v1095_v63 = vld [vmem:[%s1645_s3 + $0x38] sm:$0xff] }
  0xaa   : > { %v427_v39 = vpop.permute.xlu0 %426  ;;  %v1396_v0 = vmov 0.0|0.0   ;;  %v1398_v1 = vmov 0.0  }
  0xab   : > { %1237 = vmatprep.subr.bf16.mxu0 %v1236_v8  ;;  %1245 = vmatprep.subr.bf16.mxu1 %v1244_v9  ;;  %v375_v17 = vmax.f32 %v371_v11, 0.0  ;;  %v404_v18 = vmax.f32 %v400_v12, 0.0 }
  0xac   : > { %v367_v14 = vpop.permute.xlu1 %366  ;;  %1239 = vmatpush3.bf16.msra.mxu0 %v1236_v8  ;;  %1247 = vmatpush3.bf16.msra.mxu1 %v1244_v9 }
  0xad   : > { %v372_v15 = vadd.f32 %v367_v14, %v348_v10  ;;  %v401_v16 = vadd.f32 %v397_v13, %v367_v14 }
  0xae   : > { %v638_v2 = vpop.permute.xlu0 %637 }
  0xaf   : > { %v376_v19 = vmax.f32 %v372_v15, 0.0  ;;  %v405_v20 = vmax.f32 %v401_v16, 0.0 }
  0xb0   : > { %v422_v30 = vpop.permute.xlu1 %421 }
  0xb1   : > { %v1240_v22 = vpack.c.bf16 %v376_v19, %v375_v17  ;;  %v1248_v23 = vpack.c.bf16 %v405_v20, %v404_v18 }
  0xb2   : > { %v648_v12 = vpop.permute.xlu0 %647 }
  0xb3   : > { %1241 = vmatprep.subr.bf16.mxu0 %v1240_v22  ;;  %1249 = vmatprep.subr.bf16.mxu1 %v1248_v23 }
  0xb4   : > { %1243 = vmatpush3.bf16.msra.mxu0 %v1240_v22  ;;  %1251 = vmatpush3.bf16.msra.mxu1 %v1248_v23  ;;  %v432_v40 = vpop.permute.xlu1 %431 }
  0xb7   : > { %1167 = vmatmul.mubr.msk.f32.vlgmr.msra.gmra.mrb[0].mxu0 %vm434_vm0, %v407_v24  ;;  %1181 = vmatmul.mubr.msk.f32.vlgmr.msra.gmra.mrb[0].mxu1 %vm434_vm0, %v407_v24 }
  0xb8   : > { %1169 = vmatprep.mubr.msk.f32.mxu0 %vm434_vm0, %v408_v25  ;;  %1183 = vmatprep.mubr.msk.f32.mxu1 %vm434_vm0, %v408_v25  ;;  %v643_v3 = vpop.permute.xlu1 %642 }
  0xbb   : > { %1170 = vmatmul.mubr.msk.f32.gmra.mrb[2].mxu0 %vm434_vm0, %v409_v26  ;;  %1184 = vmatmul.mubr.msk.f32.gmra.mrb[2].mxu1 %vm434_vm0, %v409_v26 }
  0xbc   : > { %1194 = vmatprep.mubr.msk.f32.mxu0 %vm434_vm0, %v1092_v28  ;;  %1208 = vmatprep.mubr.msk.f32.mxu1 %vm434_vm0, %v1092_v28  ;;  %v653_v13 = vpop.permute.xlu1 %652 }
 0x18a   : > { %v1168_v31 = vpop.f32.mrb[0].mxu0  ;;  %v1182_v32 = vpop.f32.mrb[0].mxu1 }
 0x18b   : > { %v519_v33 = vadd.f32 %v1168_v31, %v422_v30  ;;  %v608_v34 = vadd.f32 %v1182_v32, %v422_v30  ;;  %v513_v35 = vpop.f32.mrb[1].mxu0  ;;  %v602_v36 = vpop.f32.mrb[1].mxu1 }
 0x18c   : > { %v514_v37 = vadd.f32 %v513_v35, %v417_v29  ;;  %v603_v38 = vadd.f32 %v602_v36, %v417_v29  ;;  %v290_v36 = vld [vmem:[%s1647_s5] sm:$0x1] }
 0x18d   : > { %v533_v41 = vmax.f32 %v519_v33, 0.0  ;;  %v622_v42 = vmax.f32 %v608_v34, 0.0 }
 0x18e   : > { %v532_v43 = vmax.f32 %v514_v37, 0.0  ;;  %v621_v44 = vmax.f32 %v603_v38, 0.0  ;;  %v1171_v45 = vpop.f32.mrb[2].mxu0  ;;  %v1185_v46 = vpop.f32.mrb[2].mxu1 }
 0x18f   : > { %v529_v47 = vadd.f32 %v1171_v45, %v432_v40  ;;  %v618_v48 = vadd.f32 %v1185_v46, %v432_v40  ;;  %v523_v49 = vpop.f32.mrb[3].mxu0  ;;  %v612_v50 = vpop.f32.mrb[3].mxu1 }
 0x190   : > { %v1252_v51 = vpack.c.bf16 %v533_v41, %v532_v43  ;;  %v1260_v52 = vpack.c.bf16 %v622_v42, %v621_v44  ;;  %v524_v53 = vadd.f32 %v523_v49, %v427_v39  ;;  %v613_v54 = vadd.f32 %v612_v50, %v427_v39  ;;  %v848_v37 = vpop.permute.xlu0 %847 }
 0x191   : > { %v535_v55 = vmax.f32 %v529_v47, 0.0  ;;  %v624_v56 = vmax.f32 %v618_v48, 0.0  ;;  %v853_v38 = vrot.slane %v848_v37, %v1549_v27 }
 0x192   : > { %v534_v57 = vmax.f32 %v524_v53, 0.0  ;;  %v623_v58 = vmax.f32 %v613_v54, 0.0  ;;  %1253 = vmatprep.subr.bf16.mxu0 %v1252_v51  ;;  %1261 = vmatprep.subr.bf16.mxu1 %v1260_v52 }
 0x193   : > { %1255 = vmatpush3.bf16.msra.mxu0 %v1252_v51  ;;  %1263 = vmatpush3.bf16.msra.mxu1 %v1260_v52 }
 0x194   : > { %v1256_v59 = vpack.c.bf16 %v535_v55, %v534_v57  ;;  %v1264_v60 = vpack.c.bf16 %v624_v56, %v623_v58 }
 0x196   : > { %1257 = vmatprep.subr.bf16.mxu0 %v1256_v59  ;;  %1265 = vmatprep.subr.bf16.mxu1 %v1264_v60 }
 0x197   : > { %1259 = vmatpush3.bf16.msra.mxu0 %v1256_v59  ;;  %1267 = vmatpush3.bf16.msra.mxu1 %v1264_v60 }
 0x198   : > { %1268 = vmatprep.subr.bf16.mxu0 %v1396_v0  ;;  %1274 = vmatprep.subr.bf16.mxu1 %v1396_v0 }
 0x19a   : > { %1195 = vmatmul.mubr.msk.f32.vlgmr.msra.gmra.mrb[4].mxu0 %vm434_vm0, %v1093_v61  ;;  %1209 = vmatmul.mubr.msk.f32.vlgmr.msra.gmra.mrb[4].mxu1 %vm434_vm0, %v1093_v61 }
 0x19b   : > { %1197 = vmatprep.mubr.msk.f32.mxu0 %vm434_vm0, %v1094_v62  ;;  %1211 = vmatprep.mubr.msk.f32.mxu1 %vm434_vm0, %v1094_v62 }
 0x19e   : > { %1198 = vmatmul.mubr.msk.f32.gmra.mrb[6].mxu0 %vm434_vm0, %v1095_v63  ;;  %1212 = vmatmul.mubr.msk.f32.gmra.mrb[6].mxu1 %vm434_vm0, %v1095_v63 }
 0x19f   : > { %1222 = vmatprep.mubr.msk.f32.mxu0 %vm1397_vm1, %v1398_v1  ;;  %1233 = vmatprep.mubr.msk.f32.mxu1 %vm1397_vm1, %v1398_v1 }
 0x26d   : > { %v1196_v4 = vpop.f32.mrb[4].mxu0  ;;  %v1210_v5 = vpop.f32.mrb[4].mxu1 }
 0x26e   : > { %v739_v6 = vadd.f32 %v1196_v4, %v643_v3  ;;  %v828_v7 = vadd.f32 %v1210_v5, %v643_v3  ;;  %v733_v8 = vpop.f32.mrb[5].mxu0  ;;  %v822_v9 = vpop.f32.mrb[5].mxu1 }
 0x26f   : > { %v734_v10 = vadd.f32 %v733_v8, %v638_v2  ;;  %v823_v11 = vadd.f32 %v822_v9, %v638_v2 }
 0x270   : > { %v753_v14 = vmax.f32 %v739_v6, 0.0  ;;  %v842_v15 = vmax.f32 %v828_v7, 0.0 }
 0x271   : > { %v752_v16 = vmax.f32 %v734_v10, 0.0  ;;  %v841_v17 = vmax.f32 %v823_v11, 0.0  ;;  %v1199_v18 = vpop.f32.mrb[6].mxu0  ;;  %v1213_v19 = vpop.f32.mrb[6].mxu1 }
 0x272   : > { %v749_v20 = vadd.f32 %v1199_v18, %v653_v13  ;;  %v838_v22 = vadd.f32 %v1213_v19, %v653_v13  ;;  %v743_v23 = vpop.f32.mrb[7].mxu0  ;;  %v832_v24 = vpop.f32.mrb[7].mxu1 }
 0x273   : > { %v1269_v25 = vpack.c.bf16 %v753_v14, %v752_v16  ;;  %v1275_v26 = vpack.c.bf16 %v842_v15, %v841_v17  ;;  %v744_v28 = vadd.f32 %v743_v23, %v648_v12  ;;  %v833_v29 = vadd.f32 %v832_v24, %v648_v12 }
 0x274   : > { %v755_v30 = vmax.f32 %v749_v20, 0.0  ;;  %v844_v31 = vmax.f32 %v838_v22, 0.0 }
 0x275   : > { %v754_v32 = vmax.f32 %v744_v28, 0.0  ;;  %v843_v33 = vmax.f32 %v833_v29, 0.0  ;;  %1270 = vmatpush3.bf16.msra.mxu0 %v1269_v25  ;;  %1276 = vmatpush3.bf16.msra.mxu1 %v1275_v26 }
 0x276   : > { %1271 = vmatprep.subr.bf16.mxu0 %v1396_v0  ;;  %1277 = vmatprep.subr.bf16.mxu1 %v1396_v0 }
 0x277   : > { %v1272_v34 = vpack.c.bf16 %v755_v30, %v754_v32  ;;  %v1278_v35 = vpack.c.bf16 %v844_v31, %v843_v33 }
 0x279   : > { %1273 = vmatpush3.bf16.msra.mxu0 %v1272_v34  ;;  %1279 = vmatpush3.bf16.msra.mxu1 %v1278_v35 }
 0x27c   : > { %1223 = vmatmul.mubr.msk.f32.vlgmr.msra.gmra.mrb[8].mxu0 %vm434_vm0, %v290_v36  ;;  %1234 = vmatmul.mubr.msk.f32.vlgmr.msra.gmra.mrb[8].mxu1 %vm434_vm0, %v290_v36 }
 0x34f   : > { %v923_v39 = vpop.f32.mrb[8].mxu0  ;;  %v998_v40 = vpop.f32.mrb[8].mxu1 }
 0x350   : > { %v924_v41 = vadd.f32 %v923_v39, %v853_v38  ;;  %v999_v42 = vadd.f32 %v998_v40, %v853_v38  ;;  %v1224_v43 = vpop.f32.mrb[9].mxu0  ;;  %v1235_v44 = vpop.f32.mrb[9].mxu1 }
 0x352   : > { %931 = vst.msk [vmem:[%s274_s9] sm:$0x1] %vm929_vm2, %v924_v41  ;;  %1002 = vst.msk [vmem:[%s274_s9 + $0x1] sm:$0x1] %vm929_vm2, %v999_v42 }
 0x353   : > { %1343 = shalt.err (!%p1340_p3)
}
 0x354   : > { %s1344_s21 = scalar_lea.hbm %s1600_s16, 32  ;;  %s1348_s24 = scalar_lea.hbm %s1649_s7, 64 }
 0x355   : > { %p1345_p4 = scmp.ne.s32.totalorder %s1600_s16, %s1344_s21  ;;  %p1349_p9 = scmp.lt.u32.totalorder %s1600_s16, %s1649_s7 }
 0x356   : > { %p1350_p10 = scmp.lt.u32.totalorder %s1348_s24, %s1344_s21  ;;  %p1352_p12 = scmp.lt.u32.totalorder %s1344_s21, %s1600_s16 }
 0x357   : > { %p1346_p7 = pnand %p1345_p4, %p1481_p5 }
 0x358   : > { %p1351_p11 = por %p1350_p10, %p1349_p9 }
 0x359   : > { %p1347_p8 = pneg %p1346_p7 }
 0x35a   : > { %p1353_p13 = por %p1352_p12, %p1351_p11 }
 0x35c   : > { %p1354_p0 = pnand %p1353_p13, %p1347_p8 }
 0x35e   : > { %1357 = shalt.err (!%p1354_p0)
}
 0x35f   : > { %1280 = dma.vmem_to_hbm [thread:$0]  (%p1481_p5), %s1602_s10, 32, %s1600_s16, %s1004_s6  }
 0x360 PF: > { %p1286_p1 = scmp.ge.s32.totalorder %s1392_s29, 2  ;;  %s1030_s9 = sand.u32 1, %s1380_s26  }
 0x361   : > { %s1031_s14 = scalar_lea.sflag [#allocation4], %s1030_s9 }
 0x362   : > { %p1283_p2 = pnand %p1286_p1, %p1485_p6 }
 0x364   : > { %1375 = dma.done.wait (!%p1283_p2), %s1031_s14, 32  }
 0x365   : > { %1377 = vsyncadd (!%p1283_p2), %s1031_s14, 4294967264  ;;  %p19_p3 = scmp.ge.s32.totalorder %s1468_s8, 4   ;;  %s1652_s26 = smov %s1384_s27 }
 0x366   : > { %s1653_s27 = smov %s1388_s28  ;;  %s1654_s28 = smov %s1479_s11 }
 0x367   : > { %s1655_s29 = smov %s1468_s8  ;;  %21 = sbr.rel (!%p19_p3) target bundleno = 6 (0x6), region = 85 }
 0x36e   :  { %1036 = vsyncpa [#allocation4], 1 }
 0x36f   :  { %1038 = vsyncpa [#allocation4 + $0x1], 1 }

</bundles_post_ra>
